<compile_context>
chip_gen: v6e
topology: v6e:2x2x1
jax: 0.10.0
libtpu: 0.0.40
codegen_flags: <defaults>
</compile_context>

<pallas_src>
import jax
import jax.numpy as jnp
from jax.experimental import pallas as pl
from jax.experimental.pallas import tpu as pltpu

INPUT_DIM = 16
HIDDEN_DIMS = [64, 128]
LATENT_DIM = 32


def _mlp_kernel(x_ref, w1_ref, b1_ref, w2_ref, b2_ref, w3_ref, b3_ref, o_ref):
    # Cast x to the matmul operand dtype in-kernel (cheap VPU cast, avoids an extra
    # HBM pass in the wrapper).
    x = x_ref[...].astype(w1_ref.dtype)
    # Layer 1: Linear (bf16 operands, f32 acc) + bias + ReLU in f32; Dropout -> identity.
    h1 = jnp.dot(x, w1_ref[...], preferred_element_type=jnp.float32)
    h1 = jnp.maximum(h1 + b1_ref[...], 0.0)
    h1 = h1.astype(w2_ref.dtype)          # bf16 operand for next MXU matmul
    # Layer 2: Linear + bias + ReLU (f32 epilogue); Dropout -> identity.
    h2 = jnp.dot(h1, w2_ref[...], preferred_element_type=jnp.float32)
    h2 = jnp.maximum(h2 + b2_ref[...], 0.0)
    h2 = h2.astype(w3_ref.dtype)
    # Output projection into the lane-dense (padded-to-128) output tile.
    out = jnp.dot(h2, w3_ref[...], preferred_element_type=jnp.float32)
    o_ref[...] = (out + b3_ref[...]).astype(o_ref.dtype)


def rf_signal_encoder(x, params, *, block_b=2048, compute_dtype=jnp.bfloat16):
    """x: (B, input_dim) float32. params: dict of w1,b1,w2,b2,w3,b3 (float32).

    Returns (B, latent_dim) float32.  Matmuls use `compute_dtype` operands with f32
    accumulation; bias adds / ReLU epilogues stay in f32.
    """
    B, D = x.shape
    w1, b1 = params["w1"], params["b1"]
    w2, b2 = params["w2"], params["b2"]
    w3, b3 = params["w3"], params["b3"]
    H1, H2, L = w1.shape[1], w2.shape[1], w3.shape[1]

    # --- Lane-dense output: zero-pad the last linear to a multiple of 128 columns. ---
    Lp = ((L + 127) // 128) * 128
    if Lp != L:
        w3 = jnp.pad(w3, ((0, 0), (0, Lp - L)))
        b3 = jnp.pad(b3, ((0, 0), (0, Lp - L)))

    # --- Batch tile: multiple of 8 (f32 sublanes), capped for VMEM safety. ---
    block_b = max(8, (int(block_b) // 8) * 8)
    block_b = min(block_b, 4096)                       # ~12 MiB VMEM worst case
    B_ceil8 = ((B + 7) // 8) * 8
    if block_b > B_ceil8:
        block_b = B_ceil8
    Bpad = pl.cdiv(B, block_b) * block_b
    if Bpad != B:
        # Padded rows are sliced off below; no reduction over batch exists in-kernel.
        x = jnp.pad(x, ((0, Bpad - B), (0, 0)))

    # --- bf16 weights (MXU-native on v6e/v7x); biases stay f32; x stays f32 (cast in-kernel). ---
    xc = x.astype(jnp.float32)
    w1c = w1.astype(compute_dtype)
    w2c = w2.astype(compute_dtype)
    w3c = w3.astype(compute_dtype)
    b1f = b1.astype(jnp.float32)
    b2f = b2.astype(jnp.float32)
    b3f = b3.astype(jnp.float32)

    grid = (Bpad // block_b,)
    # Weights/biases: constant index_map -> grid-invariant, not re-fetched per step.
    full = lambda shape: pl.BlockSpec(shape, lambda i: (0, 0))

    flops = 2 * Bpad * (D * H1 + H1 * H2 + H2 * Lp)
    bytes_accessed = (
        Bpad * D * 4                                   # x (f32 in)
        + (D * H1 + H1 * H2 + H2 * Lp) * 2             # weights (bf16)
        + (H1 + H2 + Lp) * 4                           # biases (f32)
        + Bpad * Lp * 4                                # out (f32)
    )

    out = pl.pallas_call(
        _mlp_kernel,
        out_shape=jax.ShapeDtypeStruct((Bpad, Lp), jnp.float32),
        grid_spec=pltpu.PrefetchScalarGridSpec(
            num_scalar_prefetch=0,
            grid=grid,
            in_specs=[
                pl.BlockSpec((block_b, D), lambda i: (i, 0)),
                full((D, H1)), full((1, H1)),
                full((H1, H2)), full((1, H2)),
                full((H2, Lp)), full((1, Lp)),
            ],
            out_specs=pl.BlockSpec((block_b, Lp), lambda i: (i, 0)),
        ),
        compiler_params=pltpu.CompilerParams(
            dimension_semantics=("parallel",)),
        cost_estimate=pl.CostEstimate(
            flops=int(flops), transcendentals=0,
            bytes_accessed=int(bytes_accessed)),
    )(xc, w1c, b1f, w2c, b2f, w3c, b3f)

    return out[:B, :L]


def init_params(key, input_dim=INPUT_DIM, hidden_dims=HIDDEN_DIMS,
                latent_dim=LATENT_DIM):
    """Deterministic PyTorch-style (uniform +/- 1/sqrt(fan_in)) init."""
    dims = [input_dim] + list(hidden_dims) + [latent_dim]
    params = {}
    for idx, (fan_in, fan_out) in enumerate(zip(dims[:-1], dims[1:]), start=1):
        key, kw, kb = jax.random.split(key, 3)
        bound = 1.0 / (fan_in ** 0.5)
        params[f"w{idx}"] = jax.random.uniform(
            kw, (fan_in, fan_out), jnp.float32, -bound, bound)
        params[f"b{idx}"] = jax.random.uniform(
            kb, (1, fan_out), jnp.float32, -bound, bound)
    return params


def _reference(x, params, compute_dtype=jnp.bfloat16):
    """Same math as the kernel: bf16 operands, f32 accumulation, f32 epilogues."""
    cd = compute_dtype
    h = jnp.dot(x.astype(cd), params["w1"].astype(cd),
                preferred_element_type=jnp.float32) + params["b1"]
    h = jnp.maximum(h, 0.0)
    h = jnp.dot(h.astype(cd), params["w2"].astype(cd),
                preferred_element_type=jnp.float32) + params["b2"]
    h = jnp.maximum(h, 0.0)
    return jnp.dot(h.astype(cd), params["w3"].astype(cd),
                   preferred_element_type=jnp.float32) + params["b3"]


if __name__ == "__main__":
    key = jax.random.PRNGKey(0)
    kx, kp, kx2 = jax.random.split(key, 3)
    params = init_params(kp)

    # Small sanity test (single grid step).
    B = 8
    x = jax.random.normal(kx, (B, INPUT_DIM), jnp.float32)
    out = jax.block_until_ready(rf_signal_encoder(x, params))
    ref = _reference(x, params)
    assert out.shape == (B, LATENT_DIM), out.shape
    assert jnp.allclose(out, ref, atol=1e-3, rtol=1e-3), float(
        jnp.max(jnp.abs(out - ref)))

    # Multi-step grid with batch padding (B not a multiple of block_b).
    B2 = 50
    x2 = jax.random.normal(kx2, (B2, INPUT_DIM), jnp.float32)
    out2 = jax.block_until_ready(rf_signal_encoder(x2, params, block_b=16))
    ref2 = _reference(x2, params)
    assert out2.shape == (B2, LATENT_DIM), out2.shape
    assert jnp.allclose(out2, ref2, atol=1e-3, rtol=1e-3), float(
        jnp.max(jnp.abs(out2 - ref2)))

    print("KERNEL_OK")
</pallas_src>

<mosaic_0001>
module attributes {stable_mosaic.version = 11 : i64} {
  func.func @_mlp_kernel(%arg0: i32, %arg1: memref<8x16xf32, #tpu.memory_space<vmem>>, %arg2: memref<16x64xbf16, #tpu.memory_space<vmem>>, %arg3: memref<1x64xf32, #tpu.memory_space<vmem>>, %arg4: memref<64x128xbf16, #tpu.memory_space<vmem>>, %arg5: memref<1x128xf32, #tpu.memory_space<vmem>>, %arg6: memref<128x128xbf16, #tpu.memory_space<vmem>>, %arg7: memref<1x128xf32, #tpu.memory_space<vmem>>, %arg8: memref<8x128xf32, #tpu.memory_space<vmem>>) attributes {dimension_semantics = [#tpu.dimension_semantics<parallel>], iteration_bounds = array<i64: 1>, scalar_prefetch = 0 : i64, scratch_operands = 0 : i64, tpu.core_type = #tpu.core_type<tc>, window_params = [{transform_indices = @transform_0, window_bounds = array<i64: 8, 16>}, {pipeline_mode = #tpu.pipeline_mode<synchronous>, transform_indices = @transform_1, window_bounds = array<i64: 16, 64>}, {pipeline_mode = #tpu.pipeline_mode<synchronous>, transform_indices = @transform_2, window_bounds = array<i64: 1, 64>}, {pipeline_mode = #tpu.pipeline_mode<synchronous>, transform_indices = @transform_3, window_bounds = array<i64: 64, 128>}, {pipeline_mode = #tpu.pipeline_mode<synchronous>, transform_indices = @transform_4, window_bounds = array<i64: 1, 128>}, {pipeline_mode = #tpu.pipeline_mode<synchronous>, transform_indices = @transform_5, window_bounds = array<i64: 128, 128>}, {pipeline_mode = #tpu.pipeline_mode<synchronous>, transform_indices = @transform_6, window_bounds = array<i64: 1, 128>}, {transform_indices = @transform_7, window_bounds = array<i64: 8, 128>}]} {
    %c0 = arith.constant 0 : index
    %c0_0 = arith.constant 0 : index
    %0 = vector.load %arg1[%c0, %c0_0] : memref<8x16xf32, #tpu.memory_space<vmem>>, vector<8x16xf32>
    %1 = arith.truncf %0 : vector<8x16xf32> to vector<8x16xbf16>
    %c0_1 = arith.constant 0 : index
    %c0_2 = arith.constant 0 : index
    %2 = vector.load %arg2[%c0_1, %c0_2] : memref<16x64xbf16, #tpu.memory_space<vmem>>, vector<16x64xbf16>
    %cst = arith.constant dense<0.000000e+00> : vector<8x64xf32>
    %3 = tpu.matmul %1, %2, %cst {dimension_numbers = #tpu.dot_dimension_numbers<[1], [0], [0], [1], [0, 0, 1, 1], [], []>} : vector<8x16xbf16>, vector<16x64xbf16>, vector<8x64xf32> -> vector<8x64xf32>
    %c0_3 = arith.constant 0 : index
    %c0_4 = arith.constant 0 : index
    %4 = vector.load %arg3[%c0_3, %c0_4] : memref<1x64xf32, #tpu.memory_space<vmem>>, vector<1x64xf32>
    %5 = vector.broadcast %4 : vector<1x64xf32> to vector<8x64xf32>
    %6 = arith.addf %3, %5 : vector<8x64xf32>
    %cst_5 = arith.constant 0.000000e+00 : f32
    %7 = vector.broadcast %cst_5 : f32 to vector<8x64xf32>
    %8 = arith.maximumf %6, %7 : vector<8x64xf32>
    %9 = arith.truncf %8 : vector<8x64xf32> to vector<8x64xbf16>
    %c0_6 = arith.constant 0 : index
    %c0_7 = arith.constant 0 : index
    %10 = vector.load %arg4[%c0_6, %c0_7] : memref<64x128xbf16, #tpu.memory_space<vmem>>, vector<64x128xbf16>
    %cst_8 = arith.constant dense<0.000000e+00> : vector<8x128xf32>
    %11 = tpu.matmul %9, %10, %cst_8 {dimension_numbers = #tpu.dot_dimension_numbers<[1], [0], [0], [1], [0, 0, 1, 1], [], []>} : vector<8x64xbf16>, vector<64x128xbf16>, vector<8x128xf32> -> vector<8x128xf32>
    %c0_9 = arith.constant 0 : index
    %c0_10 = arith.constant 0 : index
    %12 = vector.load %arg5[%c0_9, %c0_10] : memref<1x128xf32, #tpu.memory_space<vmem>>, vector<1x128xf32>
    %13 = vector.broadcast %12 : vector<1x128xf32> to vector<8x128xf32>
    %14 = arith.addf %11, %13 : vector<8x128xf32>
    %cst_11 = arith.constant 0.000000e+00 : f32
    %15 = vector.broadcast %cst_11 : f32 to vector<8x128xf32>
    %16 = arith.maximumf %14, %15 : vector<8x128xf32>
    %17 = arith.truncf %16 : vector<8x128xf32> to vector<8x128xbf16>
    %c0_12 = arith.constant 0 : index
    %c0_13 = arith.constant 0 : index
    %18 = vector.load %arg6[%c0_12, %c0_13] : memref<128x128xbf16, #tpu.memory_space<vmem>>, vector<128x128xbf16>
    %cst_14 = arith.constant dense<0.000000e+00> : vector<8x128xf32>
    %19 = tpu.matmul %17, %18, %cst_14 {dimension_numbers = #tpu.dot_dimension_numbers<[1], [0], [0], [1], [0, 0, 1, 1], [], []>} : vector<8x128xbf16>, vector<128x128xbf16>, vector<8x128xf32> -> vector<8x128xf32>
    %c0_15 = arith.constant 0 : index
    %c0_16 = arith.constant 0 : index
    %20 = vector.load %arg7[%c0_15, %c0_16] : memref<1x128xf32, #tpu.memory_space<vmem>>, vector<1x128xf32>
    %21 = vector.broadcast %20 : vector<1x128xf32> to vector<8x128xf32>
    %22 = arith.addf %19, %21 : vector<8x128xf32>
    %c0_17 = arith.constant 0 : index
    %c0_18 = arith.constant 0 : index
    %23 = vector.load %arg8[%c0_17, %c0_18] : memref<8x128xf32, #tpu.memory_space<vmem>>, vector<8x128xf32>
    tpu.vector_store %arg8[%c0_17, %c0_18], %22 {strides = array<i32>} : memref<8x128xf32, #tpu.memory_space<vmem>>, vector<8x128xf32>,
    return
  }
  func.func @transform_0(%arg0: i32) -> (i32, i32) {
    %c0_i32 = arith.constant 0 : i32
    %c0_i32_0 = arith.constant 0 : i32
    return %arg0, %c0_i32 : i32, i32
  }
  func.func @transform_1(%arg0: i32) -> (i32, i32) {
    %c0_i32 = arith.constant 0 : i32
    %c0_i32_0 = arith.constant 0 : i32
    %c0_i32_1 = arith.constant 0 : i32
    return %c0_i32, %c0_i32_0 : i32, i32
  }
  func.func @transform_2(%arg0: i32) -> (i32, i32) {
    %c0_i32 = arith.constant 0 : i32
    %c0_i32_0 = arith.constant 0 : i32
    %c0_i32_1 = arith.constant 0 : i32
    return %c0_i32, %c0_i32_0 : i32, i32
  }
  func.func @transform_3(%arg0: i32) -> (i32, i32) {
    %c0_i32 = arith.constant 0 : i32
    %c0_i32_0 = arith.constant 0 : i32
    %c0_i32_1 = arith.constant 0 : i32
    return %c0_i32, %c0_i32_0 : i32, i32
  }
  func.func @transform_4(%arg0: i32) -> (i32, i32) {
    %c0_i32 = arith.constant 0 : i32
    %c0_i32_0 = arith.constant 0 : i32
    %c0_i32_1 = arith.constant 0 : i32
    return %c0_i32, %c0_i32_0 : i32, i32
  }
  func.func @transform_5(%arg0: i32) -> (i32, i32) {
    %c0_i32 = arith.constant 0 : i32
    %c0_i32_0 = arith.constant 0 : i32
    %c0_i32_1 = arith.constant 0 : i32
    return %c0_i32, %c0_i32_0 : i32, i32
  }
  func.func @transform_6(%arg0: i32) -> (i32, i32) {
    %c0_i32 = arith.constant 0 : i32
    %c0_i32_0 = arith.constant 0 : i32
    %c0_i32_1 = arith.constant 0 : i32
    return %c0_i32, %c0_i32_0 : i32, i32
  }
  func.func @transform_7(%arg0: i32) -> (i32, i32) {
    %c0_i32 = arith.constant 0 : i32
    %c0_i32_0 = arith.constant 0 : i32
    return %arg0, %c0_i32 : i32, i32
  }
}

</mosaic_0001>

<bundles_post_ra>
// kernel: tpu_custom_call.1
= control target key start
LH: loop header
LB: loop body
LE: loop exit
PB: predicated region body
PF: predicated region fallthrough
CT: control target
= control target key end

     0   :  { %12 = vsyncpa [#allocation3], 0  ;;  %s642_s0 = inlined_call_operand.hbm [shape: f32[8,16], index: 0, kind: input, shape index: {}]   ;;  %s643_s1 = inlined_call_operand.hbm [shape: bf16[16,64], index: 1, kind: input, shape index: {}]   ;;  %s644_s2 = inlined_call_operand.vmem [shape: f32[1,64], index: 2, kind: input, shape index: {}]   ;;  %s645_s3 = inlined_call_operand.hbm [shape: bf16[64,128], index: 3, kind: input, shape index: {}]   ;;  %s646_s4 = inlined_call_operand.vmem [shape: f32[1,128], index: 4, kind: input, shape index: {}]   ;;  %s647_s5 = inlined_call_operand.hbm [shape: bf16[128,128], index: 5, kind: input, shape index: {}]   ;;  %s648_s6 = inlined_call_operand.vmem [shape: f32[1,128], index: 6, kind: input, shape index: {}]   ;;  %s649_s7 = inlined_call_operand.hbm [shape: f32[8,128], index: 7, kind: output, shape index: {}]  }
   0x1   :  { %13 = vsyncpa [#allocation6], 0 }
   0x2   :  { %14 = vsyncpa [#allocation9], 0 }
   0x3   :  { %15 = vsyncpa [#allocation4], 0  ;;  %s560_s24 = smov [#allocation5]  }
   0x4   :  { %s31_s25 = sshll.u32 %s560_s24, 4  ;;  %s32_s25 = int_to_ptr.vmem [resolvable:$true] %s31_s25 }
   0x5   :  { %s460_s26 = scalar_lea.vmem %s32_s25, 128  ;;  %p465_p1 = scmp.lt.s32.totalorder %s32_s25, %s32_s25 }
   0x6   :  { %p461_p0 = scmp.ne.s32.totalorder %s32_s25, %s460_s26  ;;  %p466_p2 = scmp.lt.s32.totalorder %s460_s26, %s460_s26 }
   0x8   :  { %p467_p3 = por %p466_p2, %p465_p1 }
   0xa   :  { %p468_p4 = pnand %p467_p3, %p461_p0 }
   0xc   :  { %471 = shalt.err (!%p468_p4)
}
   0xd   :  { %s561_s27 = smov 64   ;;  %s562_s28 = smov 4  }
   0xe   :  { %37 = dma.hbm_to_vmem [thread:$0]  %s643_s1, 128, %s32_s25, [#allocation6], %s561_s27, %s561_s27, %s562_s28  }
   0xf   :  { %s563_s8 = smov [#allocation2]   ;;  %s564_s10 = smov [#allocation7]  }
  0x10   :  { %s22_s9 = sshll.u32 %s563_s8, 4  ;;  %s45_s11 = sshll.u32 %s564_s10, 4  ;;  %s23_s9 = int_to_ptr.vmem [resolvable:$true] %s22_s9  ;;  %s46_s11 = int_to_ptr.vmem [resolvable:$true] %s45_s11 }
  0x11   :  { %s480_s12 = scalar_lea.vmem %s23_s9, 128  ;;  %p485_p6 = scmp.lt.s32.totalorder %s23_s9, %s23_s9 }
  0x12   :  { %p481_p5 = scmp.ne.s32.totalorder %s23_s9, %s480_s12  ;;  %p486_p7 = scmp.lt.s32.totalorder %s480_s12, %s480_s12 }
  0x14   :  { %p487_p8 = por %p486_p7, %p485_p6 }
  0x16   :  { %p488_p9 = pnand %p487_p8, %p481_p5 }
  0x18   :  { %491 = shalt.err (!%p488_p9)
}
  0x19   :  { %25 = dma.hbm_to_vmem [thread:$0]  %s642_s0, 128, %s23_s9, [#allocation3]  }
  0x1a   :  { %s500_s15 = scalar_lea.vmem %s46_s11, 512  ;;  %p505_p11 = scmp.lt.s32.totalorder %s46_s11, %s46_s11 }
  0x1b   :  { %p501_p10 = scmp.ne.s32.totalorder %s46_s11, %s500_s15  ;;  %p506_p12 = scmp.lt.s32.totalorder %s500_s15, %s500_s15 }
  0x1d   :  { %p507_p13 = por %p506_p12, %p505_p11 }
  0x1f   :  { %p508_p0 = pnand %p507_p13, %p501_p10 }
  0x21   :  { %511 = shalt.err (!%p508_p0)
}
  0x22   :  { %51 = dma.hbm_to_vmem [thread:$0]  %s645_s3, 512, %s46_s11, [#allocation6], %s561_s27, %s561_s27, %s562_s28  }
  0x23   :  { %s565_s17 = smov [#allocation8]  }
  0x24   :  { %s59_s18 = sshll.u32 %s565_s17, 4  ;;  %s60_s18 = int_to_ptr.vmem [resolvable:$true] %s59_s18 }
  0x25   :  { %s520_s19 = scalar_lea.vmem %s60_s18, 1024  ;;  %p525_p2 = scmp.lt.s32.totalorder %s60_s18, %s60_s18 }
  0x26   :  { %p521_p1 = scmp.ne.s32.totalorder %s60_s18, %s520_s19  ;;  %p526_p3 = scmp.lt.s32.totalorder %s520_s19, %s520_s19 }
  0x28   :  { %p527_p4 = por %p526_p3, %p525_p2 }
  0x2a   :  { %p528_p5 = pnand %p527_p4, %p521_p1 }
  0x2c   :  { %531 = shalt.err (!%p528_p5)
}
  0x2d   :  { %65 = dma.hbm_to_vmem [thread:$0]  %s647_s5, 1024, %s60_s18, [#allocation9], %s561_s27, %s561_s27, %s562_s28  }
  0x2e   :  { %552 = dma.done.wait [#allocation3], 128  }
  0x2f   :  { %553 = vsyncadd [#allocation3], 4294967168 }
  0x30   :  { %554 = dma.done.wait [#allocation6], 640  }
  0x31   :  { %555 = vsyncadd [#allocation6], 4294966656 }
  0x32   :  { %556 = dma.done.wait [#allocation9], 1024  }
  0x33   :  { %557 = vsyncadd [#allocation9], 4294966272  ;;  %v566_v0 = vmov 0.0   ;;  %vm567_vm0 = vmmov 0   ;;  %v439_v1 = vld [vmem:[#allocation5] sm:$0xff]   ;;  %v81_v2 = vld [vmem:[#allocation2] sm:$0xff] }
  0x34   :  { %392 = vmatprep.subr.bf16.mxu1 %v566_v0  ;;  %394 = vmatprep.mubr.msk.bf16.mxu1 %vm567_vm0, %v566_v0  ;;  %v82_v3 = vpack.c.bf16 %v81_v2, %v81_v2  ;;  %vm98_vm1 = vcmask 130048   ;;  %v440_v4 = vld [vmem:[#allocation7 + $0x18] sm:$0xff]   ;;  %v441_v5 = vld [vmem:[#allocation7 + $0x10] sm:$0xff]   ;;  %v442_v6 = vld [vmem:[#allocation7 + $0x8] sm:$0xff]   ;;  %vm183_vm2 = vcmask 523264   ;;  %s568_s24 = smov [#allocation10]  }
  0x35   :  { %410 = vmatprep.subr.bf16.mxu0 %v566_v0  ;;  %426 = vmatprep.mubr.msk.bf16.mxu0 %vm567_vm0, %v566_v0  ;;  %v443_v7 = vld [vmem:[#allocation7] sm:$0xff]   ;;  %v444_v8 = vld [vmem:[#allocation8 + $0x38] sm:$0xff]   ;;  %v445_v9 = vld [vmem:[#allocation8 + $0x30] sm:$0xff]   ;;  %s347_s25 = sshll.u32 %s568_s24, 4  ;;  %s348_s25 = int_to_ptr.vmem [resolvable:$true] %s347_s25 }
  0x36   :  { %393 = vmatpush3.bf16.msra.mxu1 %v439_v1  ;;  %411 = vmatpush3.bf16.msra.mxu0 %v444_v8  ;;  %v446_v10 = vld [vmem:[#allocation8 + $0x28] sm:$0xff]   ;;  %v447_v11 = vld [vmem:[#allocation8 + $0x20] sm:$0xff]   ;;  %v448_v12 = vld [vmem:[#allocation8 + $0x18] sm:$0xff]   ;;  %p537_p7 = scmp.lt.s32.totalorder %s348_s25, %s348_s25 }
  0x37   :  { %398 = vmatprep.subr.bf16.mxu1 %v566_v0  ;;  %412 = vmatprep.subr.bf16.mxu0 %v566_v0  ;;  %v449_v13 = vld [vmem:[#allocation8 + $0x10] sm:$0xff]   ;;  %v450_v22 = vld [vmem:[#allocation8 + $0x8] sm:$0xff]   ;;  %v451_v23 = vld [vmem:[#allocation8] sm:$0xff]  }
  0x38   :  { %v358_v14 = vld [vmem:[%s644_s2] ss:$0 sm:$0xff] }
  0x39   :  { %395 = vmatmul.mubr.msk.bf16.vlgmr.msra.gmra.mxu1 %vm98_vm1, %v82_v3  ;;  %v361_v24 = vld [vmem:[%s646_s4] ss:$0 sm:$0xff]  ;;  %s532_s4 = scalar_lea.vmem %s348_s25, 128 }
  0x3a   :  { %399 = vmatpush3.bf16.msra.mxu1 %v440_v4  ;;  %406 = vmatprep.mubr.msk.bf16.mxu1 %vm567_vm0, %v566_v0  ;;  %v367_v32 = vld [vmem:[%s648_s6] ss:$0 sm:$0xff]  ;;  %p533_p6 = scmp.ne.s32.totalorder %s348_s25, %s532_s4  ;;  %p538_p8 = scmp.lt.s32.totalorder %s532_s4, %s532_s4 }
  0x3b   :  { %400 = vmatprep.subr.bf16.mxu1 %v566_v0  ;;  %413 = vmatpush3.bf16.msra.mxu0 %v445_v9 }
  0x3c   :  { %414 = vmatprep.subr.bf16.mxu0 %v566_v0  ;;  %p539_p9 = por %p538_p8, %p537_p7 }
  0x3e   :  { %401 = vmatpush3.bf16.msra.mxu1 %v441_v5  ;;  %p540_p10 = pnand %p539_p9, %p533_p6 }
  0x3f   :  { %402 = vmatprep.subr.bf16.mxu1 %v566_v0  ;;  %415 = vmatpush3.bf16.msra.mxu0 %v446_v10 }
  0x40   :  { %416 = vmatprep.subr.bf16.mxu0 %v566_v0 }
  0x42   :  { %403 = vmatpush3.bf16.msra.mxu1 %v442_v6 }
  0x43   :  { %404 = vmatprep.subr.bf16.mxu1 %v566_v0  ;;  %417 = vmatpush3.bf16.msra.mxu0 %v447_v11 }
  0x44   :  { %418 = vmatprep.subr.bf16.mxu0 %v566_v0 }
  0x46   :  { %405 = vmatpush3.bf16.msra.mxu1 %v443_v7 }
  0x47   :  { %419 = vmatpush3.bf16.msra.mxu0 %v448_v12 }
  0x48   :  { %420 = vmatprep.subr.bf16.mxu0 %v566_v0 }
  0x4b   :  { %421 = vmatpush3.bf16.msra.mxu0 %v449_v13 }
  0x4c   :  { %422 = vmatprep.subr.bf16.mxu0 %v566_v0 }
  0x4f   :  { %423 = vmatpush3.bf16.msra.mxu0 %v450_v22 }
  0x50   :  { %424 = vmatprep.subr.bf16.mxu0 %v566_v0 }
  0x53   :  { %425 = vmatpush3.bf16.msra.mxu0 %v451_v23 }
  0xf9   :  { %v136_v15 = vpop.f32.mrf.mxu1 }
  0xfa   :  { %v137_v16 = vadd.f32 %v358_v14, %v136_v15 }
  0xfb   :  { %v396_v17 = vpop.f32.mrf.mxu1 }
  0xfc   :  { %v142_v18 = vmax.f32 %v137_v16, 0.0 }
  0xfd   :  { %v139_v19 = vpop.f32.mrf.mxu1 }
  0xfe   :  { %v143_v20 = vpack.c.bf16 %v142_v18, %v142_v18 }
  0xff   :  { %v397_v21 = vpop.f32.mrf.mxu1 }
 0x100   :  { %407 = vmatmul.mubr.msk.bf16.vlgmr.msra.gmra.mxu1 %vm183_vm2, %v143_v20 }
 0x1c0   :  { %v221_v25 = vpop.f32.mrf.mxu1 }
 0x1c1   :  { %v222_v26 = vadd.f32 %v361_v24, %v221_v25 }
 0x1c2   :  { %v408_v27 = vpop.f32.mrf.mxu1 }
 0x1c3   :  { %v227_v28 = vmax.f32 %v222_v26, 0.0 }
 0x1c4   :  { %v224_v29 = vpop.f32.mrf.mxu1 }
 0x1c5   :  { %v228_v30 = vpack.c.bf16 %v227_v28, %v227_v28 }
 0x1c6   :  { %v409_v31 = vpop.f32.mrf.mxu1 }
 0x1c7   :  { %427 = vmatmul.mubr.bf16.vlgmr.msra.gmra.mxu0 %v228_v30 }
 0x287   :  { %v334_v33 = vpop.f32.mrf.mxu0 }
 0x288   :  { %v335_v34 = vadd.f32 %v367_v32, %v334_v33 }
 0x289   :  { %v428_v35 = vpop.f32.mrf.mxu0 }
 0x28a   :  { %340 = vst [vmem:[#allocation10] sm:$0xff] %v335_v34 }
 0x28b   :  { %v337_v36 = vpop.f32.mrf.mxu0 }
 0x28c   :  { %543 = shalt.err (!%p540_p10)
}
 0x28d   :  { %350 = dma.vmem_to_hbm [thread:$0]  %s348_s25, 128, %s649_s7, [#allocation4]   ;;  %v429_v37 = vpop.f32.mrf.mxu0 }
 0x28e   :  { %558 = dma.done.wait [#allocation4], 128  }
 0x28f   :  { %559 = vsyncadd [#allocation4], 4294967168 }
 0x290   :  { %354 = vsyncpa [#allocation3], 1 }
 0x291   :  { %355 = vsyncpa [#allocation6], 1 }
 0x292   :  { %356 = vsyncpa [#allocation9], 1 }
 0x293   :  { %357 = vsyncpa [#allocation4], 1 }

</bundles_post_ra>
